<compile_context>
chip_gen: v7x
topology: tpu7x:2x2x1
jax: 0.10.0
libtpu: 0.0.40
codegen_flags: <defaults>
</compile_context>

<pallas_src>
import jax
import jax.numpy as jnp
from jax.experimental import pallas as pl
from jax.experimental.pallas import tpu as pltpu


def _round_up(v, m):
    return ((v + m - 1) // m) * m


def _mlp_kernel(x_ref, w1_ref, b1_ref, w2_ref, b2_ref, o_ref):
    """Fused 2-layer MLP: Linear -> ReLU -> (BN folded into W2/b2) -> Linear."""
    # Layer 1: Linear(d -> hidden), bf16 inputs, f32 accumulation on the MXU.
    h = jnp.dot(x_ref[...], w1_ref[...], preferred_element_type=jnp.float32)
    # Bias + ReLU in f32 on the VPU.
    h = jnp.maximum(h + b1_ref[...], jnp.float32(0.0))
    # Dropout / BatchNorm(eval) already folded; layer 2: Linear(hidden -> c).
    h = h.astype(w2_ref.dtype)
    out = jnp.dot(h, w2_ref[...], preferred_element_type=jnp.float32)
    o_ref[...] = (out + b2_ref[...]).astype(o_ref.dtype)


def fold_and_cast_params(params, compute_dtype=jnp.bfloat16):
    """Fold BatchNorm1d(eval) into the second Linear and cast matmul operands."""
    w1, b1, bn_scale, bn_shift, w2, b2 = params
    # y = ((relu(x@W1+b1)) * bn_scale + bn_shift) @ W2 + b2
    #   = relu(x@W1+b1) @ (bn_scale[:,None] * W2) + (b2 + bn_shift @ W2)
    w2_folded = w2 * bn_scale.reshape(-1, 1)
    b2_folded = b2 + bn_shift @ w2
    return (w1.astype(compute_dtype),
            b1.astype(jnp.float32),
            w2_folded.astype(compute_dtype),
            b2_folded.astype(jnp.float32))


def mahalanobis_mlp_forward(x, params, *, tile_m=512,
                            compute_dtype=jnp.bfloat16):
    """Pallas forward for Mahalanobis with MLP backbone.

    x: [N, d] float32 node features (edge_index is ignored by the MLP encoder).
    params: (w1, b1, bn_scale, bn_shift, w2, b2) as produced by init_params.
    Returns [N, c] float32 logits.
    """
    w1, b1, w2, b2 = fold_and_cast_params(params, compute_dtype)
    n, d = x.shape
    hidden = w1.shape[1]
    c = w2.shape[1]

    # Effective row tile: large for throughput, but never larger than the
    # (sublane-rounded) problem, and always a multiple of 8 (sublane).
    tm = min(_round_up(max(tile_m, 8), 8), _round_up(n, 8))
    n_pad = _round_up(n, tm)

    x_in = x.astype(compute_dtype)
    if n_pad != n:
        x_in = jnp.pad(x_in, ((0, n_pad - n), (0, 0)))

    grid = (n_pad // tm,)
    full = lambda i: (0, 0)

    itemsize = jnp.dtype(compute_dtype).itemsize
    cost = pl.CostEstimate(
        flops=2 * n_pad * (d * hidden + hidden * c),
        transcendentals=0,
        bytes_accessed=(n_pad * d * itemsize            # x read
                        + n_pad * c * 4                  # output write
                        + (d * hidden + hidden * c) * itemsize
                        + (hidden + c) * 4))             # weights + biases

    out = pl.pallas_call(
        _mlp_kernel,
        out_shape=jax.ShapeDtypeStruct((n_pad, c), jnp.float32),
        grid_spec=pltpu.PrefetchScalarGridSpec(
            num_scalar_prefetch=0,
            grid=grid,
            in_specs=[
                pl.BlockSpec((tm, d), lambda i: (i, 0)),   # x row tile
                pl.BlockSpec((d, hidden), full),           # W1 (full, bf16)
                pl.BlockSpec((1, hidden), full),           # b1 (f32)
                pl.BlockSpec((hidden, c), full),           # W2' (BN-folded, bf16)
                pl.BlockSpec((1, c), full),                # b2' (BN-folded, f32)
            ],
            out_specs=pl.BlockSpec((tm, c), lambda i: (i, 0)),
        ),
        compiler_params=pltpu.CompilerParams(
            dimension_semantics=("parallel",)),
        cost_estimate=cost,
    )(x_in, w1, b1, w2, b2)

    return out[:n] if n_pad != n else out


def reference_forward_f32(x, params):
    """Pure-f32 plain-JAX reference of the original module forward."""
    w1, b1, bn_scale, bn_shift, w2, b2 = params
    h = jnp.maximum(x @ w1 + b1, 0.0)
    h = h * bn_scale + bn_shift
    return h @ w2 + b2


def reference_forward_matched(x, params, compute_dtype=jnp.bfloat16):
    """Reference with the same bf16 storage / f32 accumulation as the kernel."""
    w1, b1, w2, b2 = fold_and_cast_params(params, compute_dtype)
    xh = x.astype(compute_dtype)
    h = jnp.dot(xh, w1, preferred_element_type=jnp.float32)
    h = jnp.maximum(h + b1, 0.0).astype(compute_dtype)
    return jnp.dot(h, w2, preferred_element_type=jnp.float32) + b2


def init_params(key, d, hidden, c):
    """Deterministic in-script parameter init (shapes from MLP.__init__)."""
    k1, k2, k3, k4 = jax.random.split(key, 4)
    # torch.nn.Linear stores weight as [out, in]; we keep the transpose [in, out].
    w1 = (jax.random.uniform(k1, (d, hidden), jnp.float32, -1.0, 1.0)
          / jnp.sqrt(jnp.float32(d)))
    b1 = (jax.random.uniform(k2, (1, hidden), jnp.float32, -1.0, 1.0)
          / jnp.sqrt(jnp.float32(d)))
    w2 = (jax.random.uniform(k3, (hidden, c), jnp.float32, -1.0, 1.0)
          / jnp.sqrt(jnp.float32(hidden)))
    b2 = (jax.random.uniform(k4, (1, c), jnp.float32, -1.0, 1.0)
          / jnp.sqrt(jnp.float32(hidden)))
    # BatchNorm1d default init: gamma=1, beta=0, running_mean=0, running_var=1.
    eps = 1e-5
    gamma = jnp.ones((1, hidden), jnp.float32)
    beta = jnp.zeros((1, hidden), jnp.float32)
    running_mean = jnp.zeros((1, hidden), jnp.float32)
    running_var = jnp.ones((1, hidden), jnp.float32)
    bn_scale = gamma / jnp.sqrt(running_var + eps)
    bn_shift = beta - running_mean * bn_scale
    return (w1, b1, bn_scale, bn_shift, w2, b2)


if __name__ == "__main__":
    # Small shapes consistent with the module: N nodes, d input feats,
    # hidden_channels, c output classes.  N is intentionally NOT a multiple of
    # the default tile to exercise the padded-tail path.
    N, D, HIDDEN, C = 60, 32, 32, 8

    key = jax.random.PRNGKey(0)
    kx, kp, ke = jax.random.split(key, 3)

    x = jax.random.normal(kx, (N, D), dtype=jnp.float32)   # dataset.x
    # dataset.edge_index exists in the API but is ignored by the MLP backbone.
    edge_index = jax.random.randint(ke, (2, 128), 0, N, dtype=jnp.int32)
    # TODO(synk): GCN/GAT/MixHop backbones need sparse message passing over
    # edge_index; only the MLP backbone forward is implemented here.
    # TODO(synk): detect()/sample_estimator()/get_Mahalanobis_score() are
    # host-side numpy/sklearn OOD scoring with autograd input perturbation,
    # not part of forward(); not implemented as Pallas kernels.

    params = init_params(kp, D, HIDDEN, C)

    out = mahalanobis_mlp_forward(x, params, tile_m=512)
    out = jax.block_until_ready(out)
    assert out.shape == (N, C)

    # Tight check against a reference with identical bf16-storage / f32-accum
    # semantics, plus a loose sanity check against the pure-f32 module math.
    ref_matched = reference_forward_matched(x, params)
    ref_f32 = reference_forward_f32(x, params)
    assert jnp.allclose(out, ref_matched, atol=1e-5, rtol=1e-5), \
        "mismatch vs matched-precision reference"
    assert jnp.allclose(out, ref_f32, atol=5e-2, rtol=5e-2), \
        "mismatch vs f32 reference"

    print("KERNEL_OK")
</pallas_src>

<mosaic_0001>
module attributes {stable_mosaic.version = 11 : i64} {
  func.func @_mlp_kernel(%arg0: i32, %arg1: memref<64x32xbf16, #tpu.memory_space<vmem>>, %arg2: memref<32x32xbf16, #tpu.memory_space<vmem>>, %arg3: memref<1x32xf32, #tpu.memory_space<vmem>>, %arg4: memref<32x8xbf16, #tpu.memory_space<vmem>>, %arg5: memref<1x8xf32, #tpu.memory_space<vmem>>, %arg6: memref<64x8xf32, #tpu.memory_space<vmem>>) attributes {dimension_semantics = [#tpu.dimension_semantics<parallel>], iteration_bounds = array<i64: 1>, scalar_prefetch = 0 : i64, scratch_operands = 0 : i64, tpu.core_type = #tpu.core_type<tc>, window_params = [{transform_indices = @transform_0, window_bounds = array<i64: 64, 32>}, {pipeline_mode = #tpu.pipeline_mode<synchronous>, transform_indices = @transform_1, window_bounds = array<i64: 32, 32>}, {pipeline_mode = #tpu.pipeline_mode<synchronous>, transform_indices = @transform_2, window_bounds = array<i64: 1, 32>}, {pipeline_mode = #tpu.pipeline_mode<synchronous>, transform_indices = @transform_3, window_bounds = array<i64: 32, 8>}, {pipeline_mode = #tpu.pipeline_mode<synchronous>, transform_indices = @transform_4, window_bounds = array<i64: 1, 8>}, {transform_indices = @transform_5, window_bounds = array<i64: 64, 8>}]} {
    %c0 = arith.constant 0 : index
    %c0_0 = arith.constant 0 : index
    %0 = vector.load %arg1[%c0, %c0_0] : memref<64x32xbf16, #tpu.memory_space<vmem>>, vector<64x32xbf16>
    %c0_1 = arith.constant 0 : index
    %c0_2 = arith.constant 0 : index
    %1 = vector.load %arg2[%c0_1, %c0_2] : memref<32x32xbf16, #tpu.memory_space<vmem>>, vector<32x32xbf16>
    %cst = arith.constant dense<0.000000e+00> : vector<64x32xf32>
    %2 = tpu.matmul %0, %1, %cst {dimension_numbers = #tpu.dot_dimension_numbers<[1], [0], [0], [1], [0, 0, 1, 1], [], []>} : vector<64x32xbf16>, vector<32x32xbf16>, vector<64x32xf32> -> vector<64x32xf32>
    %c0_3 = arith.constant 0 : index
    %c0_4 = arith.constant 0 : index
    %3 = vector.load %arg3[%c0_3, %c0_4] : memref<1x32xf32, #tpu.memory_space<vmem>>, vector<1x32xf32>
    %4 = vector.broadcast %3 : vector<1x32xf32> to vector<64x32xf32>
    %5 = arith.addf %2, %4 : vector<64x32xf32>
    %cst_5 = arith.constant 0.000000e+00 : f32
    %6 = vector.broadcast %cst_5 : f32 to vector<64x32xf32>
    %7 = arith.maximumf %5, %6 : vector<64x32xf32>
    %8 = arith.truncf %7 : vector<64x32xf32> to vector<64x32xbf16>
    %c0_6 = arith.constant 0 : index
    %c0_7 = arith.constant 0 : index
    %9 = vector.load %arg4[%c0_6, %c0_7] : memref<32x8xbf16, #tpu.memory_space<vmem>>, vector<32x8xbf16>
    %cst_8 = arith.constant dense<0.000000e+00> : vector<64x8xf32>
    %10 = tpu.matmul %8, %9, %cst_8 {dimension_numbers = #tpu.dot_dimension_numbers<[1], [0], [0], [1], [0, 0, 1, 1], [], []>} : vector<64x32xbf16>, vector<32x8xbf16>, vector<64x8xf32> -> vector<64x8xf32>
    %c0_9 = arith.constant 0 : index
    %c0_10 = arith.constant 0 : index
    %11 = vector.load %arg5[%c0_9, %c0_10] : memref<1x8xf32, #tpu.memory_space<vmem>>, vector<1x8xf32>
    %12 = vector.broadcast %11 : vector<1x8xf32> to vector<64x8xf32>
    %13 = arith.addf %10, %12 : vector<64x8xf32>
    %c0_11 = arith.constant 0 : index
    %c0_12 = arith.constant 0 : index
    %14 = vector.load %arg6[%c0_11, %c0_12] : memref<64x8xf32, #tpu.memory_space<vmem>>, vector<64x8xf32>
    tpu.vector_store %arg6[%c0_11, %c0_12], %13 {strides = array<i32>} : memref<64x8xf32, #tpu.memory_space<vmem>>, vector<64x8xf32>,
    return
  }
  func.func @transform_0(%arg0: i32) -> (i32, i32) {
    %c0_i32 = arith.constant 0 : i32
    %c0_i32_0 = arith.constant 0 : i32
    return %arg0, %c0_i32 : i32, i32
  }
  func.func @transform_1(%arg0: i32) -> (i32, i32) {
    %c0_i32 = arith.constant 0 : i32
    %c0_i32_0 = arith.constant 0 : i32
    %c0_i32_1 = arith.constant 0 : i32
    return %c0_i32, %c0_i32_0 : i32, i32
  }
  func.func @transform_2(%arg0: i32) -> (i32, i32) {
    %c0_i32 = arith.constant 0 : i32
    %c0_i32_0 = arith.constant 0 : i32
    %c0_i32_1 = arith.constant 0 : i32
    return %c0_i32, %c0_i32_0 : i32, i32
  }
  func.func @transform_3(%arg0: i32) -> (i32, i32) {
    %c0_i32 = arith.constant 0 : i32
    %c0_i32_0 = arith.constant 0 : i32
    %c0_i32_1 = arith.constant 0 : i32
    return %c0_i32, %c0_i32_0 : i32, i32
  }
  func.func @transform_4(%arg0: i32) -> (i32, i32) {
    %c0_i32 = arith.constant 0 : i32
    %c0_i32_0 = arith.constant 0 : i32
    %c0_i32_1 = arith.constant 0 : i32
    return %c0_i32, %c0_i32_0 : i32, i32
  }
  func.func @transform_5(%arg0: i32) -> (i32, i32) {
    %c0_i32 = arith.constant 0 : i32
    %c0_i32_0 = arith.constant 0 : i32
    return %arg0, %c0_i32 : i32, i32
  }
}

</mosaic_0001>

<bundles_post_ra>
// kernel: tpu_custom_call.1
= control target key start
LH: loop header
LB: loop body
LE: loop exit
PB: predicated region body
PF: predicated region fallthrough
CT: control target
= control target key end

     0   :  { %vm72_vm0 = vcmask 261120   ;;  %vm262_vm1 = vcmask 64512   ;;  %s437_s1 = inlined_call_operand.vmem [shape: bf16[32,32], index: 1, kind: input, shape index: {}]   ;;  %s438_s0 = inlined_call_operand.vmem [shape: bf16[64,32], index: 0, kind: input, shape index: {}]   ;;  %s439_s3 = inlined_call_operand.vmem [shape: bf16[32,8], index: 3, kind: input, shape index: {}]   ;;  %s440_s2 = inlined_call_operand.vmem [shape: f32[1,32], index: 2, kind: input, shape index: {}]   ;;  %s441_s4 = inlined_call_operand.vmem [shape: f32[1,8], index: 4, kind: input, shape index: {}]   ;;  %s442_s5 = inlined_call_operand.vmem [shape: f32[64,8], index: 5, kind: output, shape index: {}]  }
   0x1   :  { %v329_v0 = vld [vmem:[%s437_s1] sm:$0xff]   ;;  %v330_v1 = vld [vmem:[%s437_s1 + $0x8] sm:$0xff]   ;;  %v333_v4 = vld [vmem:[%s438_s0 + $0x10] sm:$0xff]  }
   0x2   :  { %305 = vmatprep.subr.bf16.mxu0 %v329_v0  ;;  %v331_v2 = vld [vmem:[%s438_s0] sm:$0xff]   ;;  %v332_v3 = vld [vmem:[%s438_s0 + $0x8] sm:$0xff]   ;;  %v334_v5 = vld [vmem:[%s438_s0 + $0x18] sm:$0xff]  }
   0x3   :  { %306 = vmatpush3.bf16.msra.mxu0 %v329_v0  ;;  %309 = vmatprep.mubr.msk.bf16.mxu0 %vm72_vm0, %v331_v2  ;;  %v335_v6 = vld [vmem:[%s439_s3] sm:$0xff]   ;;  %v336_v7 = vld [vmem:[%s439_s3 + $0x8] sm:$0xff]  }
   0x4   :  { %307 = vmatprep.subr.bf16.mxu0 %v330_v1  ;;  %317 = vmatprep.subr.bf16.mxu1 %v335_v6  ;;  %v275_v8 = vld [vmem:[%s440_s2] ss:$0 sm:$0xff] }
   0x5   :  { %318 = vmatpush3.bf16.msra.mxu1 %v335_v6  ;;  %v286_v37 = vld [vmem:[%s441_s4] ss:$0 sm:$0xff] }
   0x6   :  { %319 = vmatprep.subr.bf16.mxu1 %v336_v7 }
   0x7   :  { %308 = vmatpush3.bf16.msra.mxu0 %v330_v1 }
   0x9   :  { %320 = vmatpush3.bf16.msra.mxu1 %v336_v7 }
   0xa   :  { %310 = vmatmul.mubr.msk.bf16.vlgmr.msra.gmra.mrb[0].mxu0 %vm72_vm0, %v332_v3 }
   0xb   :  { %313 = vmatprep.mubr.msk.bf16.mxu0 %vm72_vm0, %v333_v4 }
  0x12   :  { %314 = vmatmul.mubr.msk.bf16.gmra.mrb[4].mxu0 %vm72_vm0, %v334_v5 }
  0xdd   :  { %v311_v9 = vpop.f32.mrb[0].mxu0 }
  0xde   :  { %v128_v10 = vadd.f32 %v311_v9, %v275_v8  ;;  %v119_v11 = vpop.f32.mrb[1].mxu0 }
  0xdf   :  { %v120_v12 = vadd.f32 %v275_v8, %v119_v11  ;;  %v312_v13 = vpop.f32.mrb[2].mxu0 }
  0xe0   :  { %v131_v14 = vadd.f32 %v312_v13, %v275_v8  ;;  %v122_v15 = vpop.f32.mrb[3].mxu0  ;;  %v152_v17 = vmax.f32 %v128_v10, 0.0 }
  0xe1   :  { %v123_v16 = vadd.f32 %v275_v8, %v122_v15  ;;  %v150_v19 = vmax.f32 %v120_v12, 0.0 }
  0xe2   :  { %v153_v18 = vmax.f32 %v131_v14, 0.0 }
  0xe3   :  { %v151_v20 = vmax.f32 %v123_v16, 0.0 }
  0xe4   :  { %v159_v21 = vpack.c.bf16 %v153_v18, %v152_v17 }
  0xe5   :  { %v315_v22 = vpop.f32.mrb[4].mxu0  ;;  %v158_v23 = vpack.c.bf16 %v151_v20, %v150_v19 }
  0xe6   :  { %v144_v24 = vadd.f32 %v315_v22, %v275_v8  ;;  %v135_v25 = vpop.f32.mrb[5].mxu0 }
  0xe7   :  { %v136_v26 = vadd.f32 %v275_v8, %v135_v25  ;;  %v316_v27 = vpop.f32.mrb[6].mxu0  ;;  %321 = vmatprep.mubr.msk.bf16.mxu1 %vm72_vm0, %v158_v23 }
  0xe8   :  { %v147_v28 = vadd.f32 %v316_v27, %v275_v8  ;;  %v138_v29 = vpop.f32.mrb[7].mxu0  ;;  %322 = vmatmul.mubr.msk.bf16.vlgmr.msra.gmra.mrb[0].mxu1 %vm72_vm0, %v159_v21  ;;  %v156_v31 = vmax.f32 %v144_v24, 0.0 }
  0xe9   :  { %v139_v30 = vadd.f32 %v275_v8, %v138_v29  ;;  %v154_v33 = vmax.f32 %v136_v26, 0.0 }
  0xea   :  { %v157_v32 = vmax.f32 %v147_v28, 0.0 }
  0xeb   :  { %v155_v34 = vmax.f32 %v139_v30, 0.0 }
  0xec   :  { %v161_v35 = vpack.c.bf16 %v157_v32, %v156_v31 }
  0xed   :  { %v160_v36 = vpack.c.bf16 %v155_v34, %v154_v33 }
  0xef   :  { %325 = vmatprep.mubr.msk.bf16.mxu1 %vm72_vm0, %v160_v36 }
  0xf0   :  { %326 = vmatmul.mubr.msk.bf16.gmra.mrb[4].mxu1 %vm72_vm0, %v161_v35 }
 0x1bb   :  { %v323_v38 = vpop.f32.mrb[0].mxu1 }
 0x1bc   :  { %v240_v39 = vadd.f32 %v323_v38, %v286_v37  ;;  %v231_v40 = vpop.f32.mrb[1].mxu1 }
 0x1bd   :  { %v232_v41 = vadd.f32 %v286_v37, %v231_v40  ;;  %v324_v42 = vpop.f32.mrb[2].mxu1 }
 0x1be   :  { %265 = vst.msk [vmem:[%s442_s5 + $0x10] sm:$0xff] %vm262_vm1, %v240_v39  ;;  %v243_v43 = vadd.f32 %v324_v42, %v286_v37  ;;  %v234_v44 = vpop.f32.mrb[3].mxu1 }
 0x1bf   :  { %263 = vst.msk [vmem:[%s442_s5] sm:$0xff] %vm262_vm1, %v232_v41  ;;  %v235_v45 = vadd.f32 %v286_v37, %v234_v44 }
 0x1c0   :  { %266 = vst.msk [vmem:[%s442_s5 + $0x18] sm:$0xff] %vm262_vm1, %v243_v43 }
 0x1c1   :  { %264 = vst.msk [vmem:[%s442_s5 + $0x8] sm:$0xff] %vm262_vm1, %v235_v45 }
 0x1c3   :  { %v327_v46 = vpop.f32.mrb[4].mxu1 }
 0x1c4   :  { %v256_v47 = vadd.f32 %v327_v46, %v286_v37  ;;  %v247_v48 = vpop.f32.mrb[5].mxu1 }
 0x1c5   :  { %v248_v49 = vadd.f32 %v286_v37, %v247_v48  ;;  %v328_v50 = vpop.f32.mrb[6].mxu1 }
 0x1c6   :  { %269 = vst.msk [vmem:[%s442_s5 + $0x30] sm:$0xff] %vm262_vm1, %v256_v47  ;;  %v259_v51 = vadd.f32 %v328_v50, %v286_v37  ;;  %v250_v52 = vpop.f32.mrb[7].mxu1 }
 0x1c7   :  { %267 = vst.msk [vmem:[%s442_s5 + $0x20] sm:$0xff] %vm262_vm1, %v248_v49  ;;  %v251_v53 = vadd.f32 %v286_v37, %v250_v52 }
 0x1c8   :  { %270 = vst.msk [vmem:[%s442_s5 + $0x38] sm:$0xff] %vm262_vm1, %v259_v51 }
 0x1c9   :  { %268 = vst.msk [vmem:[%s442_s5 + $0x28] sm:$0xff] %vm262_vm1, %v251_v53 }

</bundles_post_ra>
